<compile_context>
chip_gen: v5e
topology: v5e:2x2
jax: 0.10.0
libtpu: 0.0.40
codegen_flags: <defaults>
</compile_context>

<pallas_src>
import functools

import jax
import jax.numpy as jnp
from jax import lax
from jax.experimental import pallas as pl
from jax.experimental.pallas import tpu as pltpu


def _round_up(v: int, m: int) -> int:
    return ((v + m - 1) // m) * m


def _pad2d(a, rows: int, cols: int):
    """Zero-pad a 2-D array to (rows, cols); no copy if already that shape."""
    if a.shape == (rows, cols):
        return a
    return jnp.zeros((rows, cols), a.dtype).at[: a.shape[0], : a.shape[1]].set(a)


def _regression_head_kernel(*refs, training: bool):
    if training:
        x_ref, w1_ref, b1_ref, w2_ref, drop_ref, b2_ref, o_ref, acc_ref = refs
    else:
        x_ref, w1_ref, b1_ref, w2_ref, b2_ref, o_ref, acc_ref = refs
        drop_ref = None

    # Grid position is read ONLY at the kernel top level (never inside pl.when
    # bodies) -- nested-in-cond program_id is what broke the previous version.
    k = pl.program_id(1)
    nk = pl.num_programs(1)

    # ---- first K step: init f32 accumulator with the fc1 bias ---------------
    @pl.when(k == 0)
    def _init():
        acc_ref[...] = jnp.broadcast_to(b1_ref[...], acc_ref.shape)

    # ---- fc1 partial: contract x[TB,TK] with w1[H,TK] over the feature axis -
    # NT contraction keeps x in (B, F) order and w1 in its PyTorch (out, in)
    # layout (no wrapper transposes); accumulation is f32 on the MXU.
    acc_ref[...] += lax.dot_general(
        x_ref[...], w1_ref[...],
        dimension_numbers=(((1,), (1,)), ((), ())),
        preferred_element_type=jnp.float32)

    # ---- last K step: ReLU + dropout + fc2 + bias ---------------------------
    @pl.when(k == nk - 1)
    def _epilogue():
        h = jnp.maximum(acc_ref[...], 0.0)                        # ReLU (VPU)
        if training:
            h = h * drop_ref[...]                                 # inverted dropout {0., 2.}
        # fc2 (H -> 1): VPU multiply + lane reduce (XLU) beats an N=1 MXU matmul.
        out = jnp.sum(h * w2_ref[...], axis=1, keepdims=True)     # (TB, 1)
        o_ref[...] = (out + b2_ref[0]).astype(o_ref.dtype)


# v7x-safe budgets: 64 MiB physical VMEM per TC on v7x -> keep the working set
# (double-buffered tiles + accumulator) under ~28 MiB and the scoped limit at
# 40 MiB.  v5e / v6e (128 MiB physical) are comfortably inside this.
_WORKING_SET_BUDGET = 28 * 1024 * 1024
_VMEM_LIMIT_BYTES = 40 * 1024 * 1024


def _vmem_working_set(tb, tk, h_pad, stream_bytes, training):
    est = 2 * (tb + h_pad) * tk * stream_bytes        # x & w1 tiles, double-buffered
    est += tb * h_pad * 4                             # f32 accumulator scratch
    est += 2 * 2 * h_pad * 4                          # b1 / w2 rows
    est += 2 * tb * 4                                 # (tb, 1) output
    if training:
        est += 2 * tb * h_pad * 4                     # dropout scale tile
    return est


def regression_head(x, w1, b1, w2, b2, *, training: bool = False,
                    dropout_key=None, dropout_mask=None,
                    weight_dtype=jnp.bfloat16, tb=None, tk=None):
    """Pallas forward of RegressionHead.

    x : (B, F) f32   -- flat features from the CNN backbone
    w1: (H, F) f32   -- fc1.weight, PyTorch (out, in) layout
    b1: (H,)   f32
    w2: (1, H) or (H,) f32 -- fc2.weight
    b2: (1,)   f32
    weight_dtype: dtype x and w1 are streamed in (default bf16; quantizes the
                  activations as well as the weights -- accumulation stays f32).
    dropout_mask: optional (B, H) {0,1} keep-mask (training only); if None, one
                  is drawn from dropout_key (or PRNGKey(0)).
    Returns squeeze of (B, 1) -> (B,)  (0-d scalar if B == 1), like the module.
    """
    x = jnp.asarray(x)
    B, F = x.shape
    H = w1.shape[0]
    assert w1.shape == (H, F)

    stream_dtype = (jnp.dtype(weight_dtype) if weight_dtype is not None
                    else jnp.dtype(x.dtype))
    stream_bytes = stream_dtype.itemsize

    # ---- tile selection -----------------------------------------------------
    # H: pad only to the sublane granule of the stream dtype (H is a sublane
    # axis of the w1 tile; rounding to 128 would inflate w1 DMA bytes).
    h_granule = 16 if stream_bytes < 4 else 8
    H_pad = _round_up(H, h_granule)

    if tb is None:
        tb = min(_round_up(B, 8), 256)        # small-B heads: a single B tile
    assert tb % 8 == 0
    B_pad = _round_up(B, tb)
    nb = B_pad // tb

    F_pad0 = _round_up(F, 128)
    if tk is None:
        if _vmem_working_set(tb, F_pad0, H_pad, stream_bytes,
                             training) <= _WORKING_SET_BUDGET:
            # Whole feature dim in one K step: w1's block index is constant, so
            # it is DMA'd once and stays VMEM-resident across all B tiles.
            tk = F_pad0
        else:
            tk = 4096 if stream_bytes <= 2 else 2048
            tk = min(tk, F_pad0)
            while (tk > 128 and
                   _vmem_working_set(tb, tk, H_pad, stream_bytes,
                                     training) > _WORKING_SET_BUDGET):
                tk = max(128, _round_up(tk // 2, 128))
    assert tk % 128 == 0
    tk = min(tk, F_pad0)
    F_pad = _round_up(F_pad0, tk)
    nk = F_pad // tk

    # ---- host-side prep: cast to the stream dtype BEFORE padding ------------
    x_p = _pad2d(x.astype(stream_dtype), B_pad, F_pad)
    w1_p = _pad2d(jnp.asarray(w1).astype(stream_dtype), H_pad, F_pad)
    b1_p = _pad2d(jnp.asarray(b1, jnp.float32).reshape(1, H), 1, H_pad)
    w2_p = _pad2d(jnp.asarray(w2, jnp.float32).reshape(1, H), 1, H_pad)
    b2_p = jnp.asarray(b2, jnp.float32).reshape((1,))

    in_specs = [
        pl.BlockSpec((tb, tk), lambda b, k: (b, k)),       # x tile
        pl.BlockSpec((H_pad, tk), lambda b, k: (0, k)),    # w1 tile (PyTorch layout)
        pl.BlockSpec((1, H_pad), lambda b, k: (0, 0)),     # b1 row
        pl.BlockSpec((1, H_pad), lambda b, k: (0, 0)),     # w2 row
    ]
    args = [x_p, w1_p, b1_p, w2_p]

    if training:
        # Dropout(0.5): keep-mask drawn host-side (B*H values, negligible HBM
        # traffic vs. w1) and streamed as an inverted-dropout scale {0., 2.}.
        # TODO(synk): an on-chip pltpu.prng_* mask would avoid even this tiny
        # stream, at the cost of interpret-mode portability.
        if dropout_mask is None:
            key = dropout_key if dropout_key is not None else jax.random.PRNGKey(0)
            dropout_mask = jax.random.bernoulli(key, 0.5, (B, H))
        scale = jnp.asarray(dropout_mask, jnp.float32).reshape(B, H) * 2.0
        args.append(_pad2d(scale, B_pad, H_pad))
        in_specs.append(pl.BlockSpec((tb, H_pad), lambda b, k: (b, 0)))

    in_specs.append(pl.BlockSpec(memory_space=pltpu.MemorySpace.SMEM))  # b2 scalar
    args.append(b2_p)

    grid_spec = pltpu.PrefetchScalarGridSpec(
        num_scalar_prefetch=0,
        grid=(nb, nk),                                     # reduction (K) axis last
        in_specs=in_specs,
        out_specs=pl.BlockSpec((tb, 1), lambda b, k: (b, 0)),
        scratch_shapes=[pltpu.VMEM((tb, H_pad), jnp.float32)],
    )

    out = pl.pallas_call(
        functools.partial(_regression_head_kernel, training=training),
        out_shape=jax.ShapeDtypeStruct((B_pad, 1), x.dtype),
        grid_spec=grid_spec,
        compiler_params=pltpu.CompilerParams(
            # HBM-bound: one TC already saturates HBM; a v7x 2-core split would
            # stream w1 twice -> don't request a megacore split.
            dimension_semantics=("arbitrary", "arbitrary"),
            vmem_limit_bytes=_VMEM_LIMIT_BYTES,
        ),
    )(*args)

    # Drop batch padding, then mimic torch's x.squeeze(): (B, 1) -> (B,), or a
    # 0-d scalar when B == 1.
    return jnp.squeeze(out[:B])


def init_params(key, in_features: int, hidden_dim: int = 256):
    """nn.Linear-style U(-1/sqrt(fan_in), 1/sqrt(fan_in)) init, PyTorch layouts."""
    k1, k2, k3, k4 = jax.random.split(key, 4)
    lim1 = 1.0 / float(in_features) ** 0.5
    lim2 = 1.0 / float(hidden_dim) ** 0.5
    w1 = jax.random.uniform(k1, (hidden_dim, in_features), jnp.float32, -lim1, lim1)
    b1 = jax.random.uniform(k2, (hidden_dim,), jnp.float32, -lim1, lim1)
    w2 = jax.random.uniform(k3, (1, hidden_dim), jnp.float32, -lim2, lim2)
    b2 = jax.random.uniform(k4, (1,), jnp.float32, -lim2, lim2)
    return w1, b1, w2, b2


def reference(x, w1, b1, w2, b2, drop_scale=None):
    h = jnp.maximum(x @ w1.T + b1, 0.0)
    if drop_scale is not None:
        h = h * drop_scale
    return jnp.squeeze(h @ jnp.reshape(w2, (-1, 1)) + jnp.reshape(b2, (1, 1)))


if __name__ == "__main__":
    B, F, H = 2, 512, 256
    key = jax.random.PRNGKey(0)
    kx, kp, km = jax.random.split(key, 3)
    x = jax.random.normal(kx, (B, F), jnp.float32)
    w1, b1, w2, b2 = init_params(kp, F, H)
    ref = reference(x, w1, b1, w2, b2)

    # 1) Default: eval mode, bf16 streaming, resident w1 (single K step).
    out = jax.block_until_ready(regression_head(x, w1, b1, w2, b2))
    assert out.shape == ref.shape == (B,)
    assert jnp.allclose(out, ref, atol=3e-2, rtol=3e-2), (out, ref)

    # 2) f32 streaming + forced K tiling (exercises the accumulate-over-K path).
    out32 = jax.block_until_ready(
        regression_head(x, w1, b1, w2, b2, weight_dtype=jnp.float32, tk=128))
    assert out32.shape == (B,)
    assert jnp.allclose(out32, ref, atol=1e-4, rtol=1e-4), (out32, ref)

    # 3) Training mode with an explicit keep-mask -> exact reference available.
    keep = jax.random.bernoulli(km, 0.5, (B, H))
    out_tr = jax.block_until_ready(
        regression_head(x, w1, b1, w2, b2, training=True, dropout_mask=keep,
                        weight_dtype=jnp.float32, tk=256))
    ref_tr = reference(x, w1, b1, w2, b2, drop_scale=keep.astype(jnp.float32) * 2.0)
    assert out_tr.shape == ref_tr.shape == (B,)
    assert jnp.allclose(out_tr, ref_tr, atol=1e-4, rtol=1e-4), (out_tr, ref_tr)

    print("KERNEL_OK")
</pallas_src>

<mosaic_0001>
module attributes {stable_mosaic.version = 11 : i64} {
  func.func @_regression_head_kernel(%arg0: i32, %arg1: i32, %arg2: memref<8x512xbf16, #tpu.memory_space<vmem>>, %arg3: memref<256x512xbf16, #tpu.memory_space<vmem>>, %arg4: memref<1x256xf32, #tpu.memory_space<vmem>>, %arg5: memref<1x256xf32, #tpu.memory_space<vmem>>, %arg6: memref<1xf32, #tpu.memory_space<smem>>, %arg7: memref<8x1xf32, #tpu.memory_space<vmem>>, %arg8: memref<8x256xf32, #tpu.memory_space<vmem>>) attributes {dimension_semantics = [#tpu.dimension_semantics<arbitrary>, #tpu.dimension_semantics<arbitrary>], iteration_bounds = array<i64: 1, 1>, scalar_prefetch = 0 : i64, scratch_operands = 1 : i64, tpu.core_type = #tpu.core_type<tc>, window_params = [{transform_indices = @transform_0, window_bounds = array<i64: 8, 512>}, {transform_indices = @transform_1, window_bounds = array<i64: 256, 512>}, {pipeline_mode = #tpu.pipeline_mode<synchronous>, transform_indices = @transform_2, window_bounds = array<i64: 1, 256>}, {pipeline_mode = #tpu.pipeline_mode<synchronous>, transform_indices = @transform_3, window_bounds = array<i64: 1, 256>}, {transform_indices = @transform_4, window_bounds = array<i64: 1>}, {transform_indices = @transform_5, window_bounds = array<i64: 8, 1>}]} {
    %c0_i32 = arith.constant 0 : i32
    %0 = arith.cmpi eq, %arg1, %c0_i32 : i32
    %1 = arith.extui %0 : i1 to i32
    %c0_i32_0 = arith.constant 0 : i32
    %2 = arith.cmpi ne, %1, %c0_i32_0 : i32
    scf.if %2 {
      %c0_10 = arith.constant 0 : index
      %c0_11 = arith.constant 0 : index
      %12 = vector.load %arg4[%c0_10, %c0_11] : memref<1x256xf32, #tpu.memory_space<vmem>>, vector<1x256xf32>
      %13 = vector.shape_cast %12 : vector<1x256xf32> to vector<1x256xf32>
      %14 = vector.broadcast %13 : vector<1x256xf32> to vector<8x256xf32>
      %c0_12 = arith.constant 0 : index
      %c0_13 = arith.constant 0 : index
      %15 = vector.load %arg8[%c0_12, %c0_13] : memref<8x256xf32, #tpu.memory_space<vmem>>, vector<8x256xf32>
      tpu.vector_store %arg8[%c0_12, %c0_13], %14 {strides = array<i32>} : memref<8x256xf32, #tpu.memory_space<vmem>>, vector<8x256xf32>,
    } else {
    }
    %c0 = arith.constant 0 : index
    %c0_1 = arith.constant 0 : index
    %3 = vector.load %arg8[%c0, %c0_1] : memref<8x256xf32, #tpu.memory_space<vmem>>, vector<8x256xf32>
    %c0_2 = arith.constant 0 : index
    %c0_3 = arith.constant 0 : index
    %4 = vector.load %arg2[%c0_2, %c0_3] : memref<8x512xbf16, #tpu.memory_space<vmem>>, vector<8x512xbf16>
    %c0_4 = arith.constant 0 : index
    %c0_5 = arith.constant 0 : index
    %5 = vector.load %arg3[%c0_4, %c0_5] : memref<256x512xbf16, #tpu.memory_space<vmem>>, vector<256x512xbf16>
    %cst = arith.constant dense<0.000000e+00> : vector<8x256xf32>
    %6 = tpu.matmul %4, %5, %cst {dimension_numbers = #tpu.dot_dimension_numbers<[1], [1], [0], [0], [0, 0, 1, 0], [], []>} : vector<8x512xbf16>, vector<256x512xbf16>, vector<8x256xf32> -> vector<8x256xf32>
    %7 = arith.addf %3, %6 : vector<8x256xf32>
    %c0_6 = arith.constant 0 : index
    %c0_7 = arith.constant 0 : index
    %8 = vector.load %arg8[%c0_6, %c0_7] : memref<8x256xf32, #tpu.memory_space<vmem>>, vector<8x256xf32>
    tpu.vector_store %arg8[%c0_6, %c0_7], %7 {strides = array<i32>} : memref<8x256xf32, #tpu.memory_space<vmem>>, vector<8x256xf32>,
    %c0_i32_8 = arith.constant 0 : i32
    %9 = arith.cmpi eq, %arg1, %c0_i32_8 : i32
    %10 = arith.extui %9 : i1 to i32
    %c0_i32_9 = arith.constant 0 : i32
    %11 = arith.cmpi ne, %10, %c0_i32_9 : i32
    scf.if %11 {
      %c0_10 = arith.constant 0 : index
      %c0_11 = arith.constant 0 : index
      %12 = vector.load %arg8[%c0_10, %c0_11] : memref<8x256xf32, #tpu.memory_space<vmem>>, vector<8x256xf32>
      %cst_12 = arith.constant 0.000000e+00 : f32
      %13 = vector.broadcast %cst_12 : f32 to vector<8x256xf32>
      %14 = arith.maximumf %12, %13 : vector<8x256xf32>
      %c0_13 = arith.constant 0 : index
      %c0_14 = arith.constant 0 : index
      %15 = vector.load %arg5[%c0_13, %c0_14] : memref<1x256xf32, #tpu.memory_space<vmem>>, vector<1x256xf32>
      %16 = vector.broadcast %15 : vector<1x256xf32> to vector<8x256xf32>
      %17 = arith.mulf %14, %16 : vector<8x256xf32>
      %cst_15 = arith.constant dense<0.000000e+00> : vector<8xf32>
      %18 = vector.multi_reduction <add>, %17, %cst_15 [1] : vector<8x256xf32> to vector<8xf32>
      %19 = vector.shape_cast %18 : vector<8xf32> to vector<8x1xf32>
      %c0_16 = arith.constant 0 : index
      %20 = memref.load %arg6[%c0_16] : memref<1xf32, #tpu.memory_space<smem>>
      %21 = vector.broadcast %20 : f32 to vector<8x1xf32>
      %22 = arith.addf %19, %21 : vector<8x1xf32>
      %c0_17 = arith.constant 0 : index
      %c0_18 = arith.constant 0 : index
      %23 = vector.load %arg7[%c0_17, %c0_18] : memref<8x1xf32, #tpu.memory_space<vmem>>, vector<8x1xf32>
      tpu.vector_store %arg7[%c0_17, %c0_18], %22 {strides = array<i32>} : memref<8x1xf32, #tpu.memory_space<vmem>>, vector<8x1xf32>,
    } else {
    }
    return
  }
  func.func @transform_0(%arg0: i32, %arg1: i32) -> (i32, i32) {
    %c0_i32 = arith.constant 0 : i32
    return %arg0, %arg1 : i32, i32
  }
  func.func @transform_1(%arg0: i32, %arg1: i32) -> (i32, i32) {
    %c0_i32 = arith.constant 0 : i32
    %c0_i32_0 = arith.constant 0 : i32
    return %c0_i32, %arg1 : i32, i32
  }
  func.func @transform_2(%arg0: i32, %arg1: i32) -> (i32, i32) {
    %c0_i32 = arith.constant 0 : i32
    %c0_i32_0 = arith.constant 0 : i32
    %c0_i32_1 = arith.constant 0 : i32
    return %c0_i32, %c0_i32_0 : i32, i32
  }
  func.func @transform_3(%arg0: i32, %arg1: i32) -> (i32, i32) {
    %c0_i32 = arith.constant 0 : i32
    %c0_i32_0 = arith.constant 0 : i32
    %c0_i32_1 = arith.constant 0 : i32
    return %c0_i32, %c0_i32_0 : i32, i32
  }
  func.func @transform_4(%arg0: i32, %arg1: i32) -> i32 {
    %c0_i32 = arith.constant 0 : i32
    %c0_i32_0 = arith.constant 0 : i32
    return %c0_i32 : i32
  }
  func.func @transform_5(%arg0: i32, %arg1: i32) -> (i32, i32) {
    %c0_i32 = arith.constant 0 : i32
    %c0_i32_0 = arith.constant 0 : i32
    return %arg0, %c0_i32 : i32, i32
  }
}

</mosaic_0001>

<bundles_post_ra>
// kernel: tpu_custom_call.1
= control target key start
LH: loop header
LB: loop body
LE: loop exit
PB: predicated region body
PF: predicated region fallthrough
CT: control target
= control target key end

     0   :  { %11 = vsyncpa [#allocation5], 0  ;;  %s1046_s0 = inlined_call_operand.hbm [shape: bf16[8,512], index: 0, kind: input, shape index: {}]   ;;  %s1047_s1 = inlined_call_operand.hbm [shape: bf16[256,512], index: 1, kind: input, shape index: {}]   ;;  %s1048_s2 = inlined_call_operand.vmem [shape: f32[1,256], index: 2, kind: input, shape index: {}]   ;;  %s1049_s3 = inlined_call_operand.vmem [shape: f32[1,256], index: 3, kind: input, shape index: {}]   ;;  %s1050_s4 = inlined_call_operand.<no memory space> [shape: f32[1], index: 4, kind: input, shape index: {}]   ;;  %s1051_s5 = inlined_call_operand.vmem [shape: f32[8,1], index: 5, kind: output, shape index: {}]  }
   0x1   :  { %s18_s20 = sshll.u32 %s1046_s0, 4  ;;  %s19_s20 = int_to_ptr.hbm [resolvable:$true] %s18_s20 }
   0x2   :  { %12 = vsyncpa [#allocation7], 0  ;;  %s978_s21 = smov [#allocation4]   ;;  %s28_s25 = sshll.u32 %s1047_s1, 4  ;;  %s29_s25 = int_to_ptr.hbm [resolvable:$true] %s28_s25 }
   0x3   :  { %s20_s22 = sshll.u32 %s978_s21, 4  ;;  %s979_s26 = smov [#allocation6]   ;;  %s21_s22 = int_to_ptr.vmem [resolvable:$true] %s20_s22 }
   0x4   :  { %23 = dma.hbm_to_vmem [thread:$0]  %s19_s20, 256, %s21_s22, [#allocation5]  }
   0x5   :  { %s30_s27 = sshll.u32 %s979_s26, 4  ;;  %s980_s28 = smov 256   ;;  %s31_s27 = int_to_ptr.vmem [resolvable:$true] %s30_s27 }
   0x6   :  { %s981_s29 = smov 16  }
   0x7   :  { %36 = dma.hbm_to_vmem [thread:$0]  %s29_s25, 8192, %s31_s27, [#allocation7], %s980_s28, %s980_s28, %s981_s29  }
   0x8   :  { %974 = dma.done.wait [#allocation5], 256  }
   0x9   :  { %975 = vsyncadd [#allocation5], 4294967040 }
   0xa   :  { %976 = dma.done.wait [#allocation7], 8192  }
   0xb   :  { %977 = vsyncadd [#allocation7], 4294959104  ;;  %v716_v0 = vld [vmem:[#allocation6 + $0xe0] sm:$0xf]  ;;  %v888_v1 = vld [vmem:[#allocation6 + $0xec] sm:$0xf0] }
   0xc   :  { %v886_v2 = vld [vmem:[#allocation6 + $0xe4] sm:$0xf]  ;;  %v717_v3 = vor.u32 %v888_v1, %v716_v0  ;;  %v718_v4 = vld [vmem:[#allocation6 + $0xf0] sm:$0xf0]  ;;  %v724_v5 = vld [vmem:[#allocation6 + $0xe8] sm:$0xf] }
   0xd   :  { %v889_v6 = vld [vmem:[#allocation6 + $0xf4] sm:$0xf0]  ;;  %v721_v7 = vor.u32 %v886_v2, %v718_v4  ;;  %v887_v9 = vld [vmem:[#allocation6 + $0xec] sm:$0xf]  ;;  %v726_v10 = vld [vmem:[#allocation6 + $0xf8] sm:$0xf0] }
   0xe   :  { %v725_v8 = vor.u32 %v889_v6, %v724_v5  ;;  %465 = vmatpush.bf16.xpose.msra.mxu0 %v717_v3  ;;  %v729_v11 = vor.u32 %v887_v9, %v726_v10  ;;  %v700_v12 = vld [vmem:[#allocation6 + $0xc0] sm:$0xf]  ;;  %v884_v13 = vld [vmem:[#allocation6 + $0xcc] sm:$0xf0]  ;;  %v882_v14 = vld [vmem:[#allocation6 + $0xc4] sm:$0xf] }
   0xf   :  { %478 = vmatpush.bf16.xpose.msra.mxu1 %v721_v7  ;;  %v702_v15 = vld [vmem:[#allocation6 + $0xd0] sm:$0xf0]  ;;  %v708_v16 = vld [vmem:[#allocation6 + $0xc8] sm:$0xf]  ;;  %v885_v17 = vld [vmem:[#allocation6 + $0xd4] sm:$0xf0]  ;;  %v701_v20 = vor.u32 %v884_v13, %v700_v12 }
  0x10   :  { %491 = vmatpush.bf16.xpose.msra.mxu2 %v725_v8  ;;  %504 = vmatpush.bf16.xpose.msra.mxu3 %v729_v11  ;;  %v883_v18 = vld [vmem:[#allocation6 + $0xcc] sm:$0xf]  ;;  %v710_v19 = vld [vmem:[#allocation6 + $0xd8] sm:$0xf0]  ;;  %v705_v21 = vor.u32 %v882_v14, %v702_v15  ;;  %v709_v22 = vor.u32 %v885_v17, %v708_v16  ;;  %v684_v24 = vld [vmem:[#allocation6 + $0xa0] sm:$0xf] }
  0x11   :  { %v713_v23 = vor.u32 %v883_v18, %v710_v19  ;;  %v880_v25 = vld [vmem:[#allocation6 + $0xac] sm:$0xf0]  ;;  %v878_v26 = vld [vmem:[#allocation6 + $0xa4] sm:$0xf]  ;;  %v686_v27 = vld [vmem:[#allocation6 + $0xb0] sm:$0xf0] }
  0x12   :  { %v692_v28 = vld [vmem:[#allocation6 + $0xa8] sm:$0xf]  ;;  %v881_v29 = vld [vmem:[#allocation6 + $0xb4] sm:$0xf0]  ;;  %v879_v30 = vld [vmem:[#allocation6 + $0xac] sm:$0xf]  ;;  %v685_v32 = vor.u32 %v880_v25, %v684_v24  ;;  %v689_v33 = vor.u32 %v878_v26, %v686_v27 }
  0x13   :  { %v694_v31 = vld [vmem:[#allocation6 + $0xb8] sm:$0xf0]  ;;  %v693_v34 = vor.u32 %v881_v29, %v692_v28  ;;  %v668_v36 = vld [vmem:[#allocation6 + $0x80] sm:$0xf]  ;;  %v876_v37 = vld [vmem:[#allocation6 + $0x8c] sm:$0xf0] }
  0x14   :  { %v697_v35 = vor.u32 %v879_v30, %v694_v31  ;;  %v874_v38 = vld [vmem:[#allocation6 + $0x84] sm:$0xf]  ;;  %v670_v39 = vld [vmem:[#allocation6 + $0x90] sm:$0xf0]  ;;  %v676_v40 = vld [vmem:[#allocation6 + $0x88] sm:$0xf]  ;;  %v669_v44 = vor.u32 %v876_v37, %v668_v36 }
  0x15   :  { %v877_v41 = vld [vmem:[#allocation6 + $0x94] sm:$0xf0]  ;;  %v875_v42 = vld [vmem:[#allocation6 + $0x8c] sm:$0xf]  ;;  %v678_v43 = vld [vmem:[#allocation6 + $0x98] sm:$0xf0]  ;;  %v673_v45 = vor.u32 %v874_v38, %v670_v39 }
  0x16   :  { %466 = vmatpush.bf16.xpose.msra.mxu0 %v701_v20  ;;  %v677_v46 = vor.u32 %v877_v41, %v676_v40  ;;  %v681_v47 = vor.u32 %v875_v42, %v678_v43  ;;  %v652_v48 = vld [vmem:[#allocation6 + $0x60] sm:$0xf]  ;;  %v872_v49 = vld [vmem:[#allocation6 + $0x6c] sm:$0xf0]  ;;  %v870_v50 = vld [vmem:[#allocation6 + $0x64] sm:$0xf] }
  0x17   :  { %479 = vmatpush.bf16.xpose.msra.mxu1 %v705_v21  ;;  %v654_v51 = vld [vmem:[#allocation6 + $0x70] sm:$0xf0]  ;;  %v660_v52 = vld [vmem:[#allocation6 + $0x68] sm:$0xf]  ;;  %v873_v53 = vld [vmem:[#allocation6 + $0x74] sm:$0xf0]  ;;  %v653_v56 = vor.u32 %v872_v49, %v652_v48 }
  0x18   :  { %492 = vmatpush.bf16.xpose.msra.mxu2 %v709_v22  ;;  %505 = vmatpush.bf16.xpose.msra.mxu3 %v713_v23  ;;  %v871_v54 = vld [vmem:[#allocation6 + $0x6c] sm:$0xf]  ;;  %v662_v55 = vld [vmem:[#allocation6 + $0x78] sm:$0xf0]  ;;  %v657_v57 = vor.u32 %v870_v50, %v654_v51  ;;  %v661_v58 = vor.u32 %v873_v53, %v660_v52  ;;  %v636_v60 = vld [vmem:[#allocation6 + $0x40] sm:$0xf] }
  0x19   :  { %v665_v59 = vor.u32 %v871_v54, %v662_v55  ;;  %v868_v61 = vld [vmem:[#allocation6 + $0x4c] sm:$0xf0]  ;;  %v866_v62 = vld [vmem:[#allocation6 + $0x44] sm:$0xf]  ;;  %v638_v63 = vld [vmem:[#allocation6 + $0x50] sm:$0xf0] }
  0x1a   :  { %v644_v0 = vld [vmem:[#allocation6 + $0x48] sm:$0xf]  ;;  %v869_v1 = vld [vmem:[#allocation6 + $0x54] sm:$0xf0]  ;;  %v867_v2 = vld [vmem:[#allocation6 + $0x4c] sm:$0xf]  ;;  %v637_v4 = vor.u32 %v868_v61, %v636_v60  ;;  %v641_v5 = vor.u32 %v866_v62, %v638_v63 }
  0x1b   :  { %v646_v3 = vld [vmem:[#allocation6 + $0x58] sm:$0xf0]  ;;  %v645_v6 = vor.u32 %v869_v1, %v644_v0  ;;  %v620_v8 = vld [vmem:[#allocation6 + $0x20] sm:$0xf]  ;;  %v864_v9 = vld [vmem:[#allocation6 + $0x2c] sm:$0xf0] }
  0x1c   :  { %v649_v7 = vor.u32 %v867_v2, %v646_v3  ;;  %v862_v10 = vld [vmem:[#allocation6 + $0x24] sm:$0xf]  ;;  %v622_v11 = vld [vmem:[#allocation6 + $0x30] sm:$0xf0]  ;;  %v628_v12 = vld [vmem:[#allocation6 + $0x28] sm:$0xf]  ;;  %v621_v16 = vor.u32 %v864_v9, %v620_v8 }
  0x1d   :  { %v865_v13 = vld [vmem:[#allocation6 + $0x34] sm:$0xf0]  ;;  %v863_v14 = vld [vmem:[#allocation6 + $0x2c] sm:$0xf]  ;;  %v630_v15 = vld [vmem:[#allocation6 + $0x38] sm:$0xf0]  ;;  %v625_v17 = vor.u32 %v862_v10, %v622_v11 }
  0x1e   :  { %467 = vmatpush.bf16.xpose.msra.mxu0 %v685_v32  ;;  %v629_v18 = vor.u32 %v865_v13, %v628_v12  ;;  %v633_v19 = vor.u32 %v863_v14, %v630_v15  ;;  %v604_v20 = vld [vmem:[#allocation6] sm:$0xf]  ;;  %v860_v21 = vld [vmem:[#allocation6 + $0xc] sm:$0xf0]  ;;  %v858_v22 = vld [vmem:[#allocation6 + $0x4] sm:$0xf] }
  0x1f   :  { %480 = vmatpush.bf16.xpose.msra.mxu1 %v689_v33  ;;  %v606_v23 = vld [vmem:[#allocation6 + $0x10] sm:$0xf0]  ;;  %v612_v24 = vld [vmem:[#allocation6 + $0x8] sm:$0xf]  ;;  %v861_v25 = vld [vmem:[#allocation6 + $0x14] sm:$0xf0]  ;;  %v605_v31 = vor.u32 %v860_v21, %v604_v20 }
  0x20   :  { %493 = vmatpush.bf16.xpose.msra.mxu2 %v693_v34  ;;  %506 = vmatpush.bf16.xpose.msra.mxu3 %v697_v35  ;;  %v859_v26 = vld [vmem:[#allocation6 + $0xc] sm:$0xf]  ;;  %v614_v27 = vld [vmem:[#allocation6 + $0x18] sm:$0xf0]  ;;  %v844_v28 = vld [vmem:[#allocation6 + $0x1e0] sm:$0xf]  ;;  %v609_v35 = vor.u32 %v858_v22, %v606_v23  ;;  %v613_v36 = vor.u32 %v861_v25, %v612_v24 }
  0x21   :  { %v920_v29 = vld [vmem:[#allocation6 + $0x1ec] sm:$0xf0]  ;;  %v918_v30 = vld [vmem:[#allocation6 + $0x1e4] sm:$0xf]  ;;  %v846_v32 = vld [vmem:[#allocation6 + $0x1f0] sm:$0xf0]  ;;  %v617_v39 = vor.u32 %v859_v26, %v614_v27 }
  0x22   :  { %v852_v33 = vld [vmem:[#allocation6 + $0x1e8] sm:$0xf]  ;;  %v921_v34 = vld [vmem:[#allocation6 + $0x1f4] sm:$0xf0]  ;;  %v919_v37 = vld [vmem:[#allocation6 + $0x1ec] sm:$0xf]  ;;  %v845_v40 = vor.u32 %v920_v29, %v844_v28  ;;  %v849_v41 = vor.u32 %v918_v30, %v846_v32 }
  0x23   :  { %v854_v38 = vld [vmem:[#allocation6 + $0x1f8] sm:$0xf0]  ;;  %v853_v42 = vor.u32 %v921_v34, %v852_v33  ;;  %v836_v48 = vld [vmem:[#allocation6 + $0x1c8] sm:$0xf]  ;;  %v917_v49 = vld [vmem:[#allocation6 + $0x1d4] sm:$0xf0] }
  0x24   :  { %v857_v43 = vor.u32 %v919_v37, %v854_v38  ;;  %v66_v50 = vld [vmem:[#allocation4 + $0x8] sm:$0xff]  ;;  %v915_v51 = vld [vmem:[#allocation6 + $0x1cc] sm:$0xf]  ;;  %v812_v60 = vld [vmem:[#allocation6 + $0x1a0] sm:$0xf]  ;;  %vm594_vm0 = vcmask 7168  }
  0x25   :  { %v838_v52 = vld [vmem:[#allocation6 + $0x1d8] sm:$0xf0]  ;;  %v135_v53 = vunpack.c.l.b16 %v66_v50  ;;  %v912_v61 = vld [vmem:[#allocation6 + $0x1ac] sm:$0xf0]  ;;  %v910_v62 = vld [vmem:[#allocation6 + $0x1a4] sm:$0xf] }
  0x26   :  { %468 = vmatpush.bf16.xpose.msra.mxu0 %v669_v44  ;;  %v828_v44 = vld [vmem:[#allocation6 + $0x1c0] sm:$0xf]  ;;  %v65_v0 = vld [vmem:[#allocation4] sm:$0xff]  ;;  %v820_v2 = vld [vmem:[#allocation6 + $0x1a8] sm:$0xf]  ;;  %v813_v8 = vor.u32 %v912_v61, %v812_v60 }
  0x27   :  { %481 = vmatpush.bf16.xpose.msra.mxu1 %v673_v45  ;;  %v916_v45 = vld [vmem:[#allocation6 + $0x1cc] sm:$0xf0]  ;;  %v814_v1 = vld [vmem:[#allocation6 + $0x1b0] sm:$0xf0]  ;;  %v913_v3 = vld [vmem:[#allocation6 + $0x1b4] sm:$0xf0] }
  0x28   :  { %494 = vmatpush.bf16.xpose.msra.mxu2 %v677_v46  ;;  %507 = vmatpush.bf16.xpose.msra.mxu3 %v681_v47  ;;  %v914_v46 = vld [vmem:[#allocation6 + $0x1c4] sm:$0xf]  ;;  %v830_v47 = vld [vmem:[#allocation6 + $0x1d0] sm:$0xf0]  ;;  %v829_v54 = vor.u32 %v916_v45, %v828_v44  ;;  %v817_v11 = vor.u32 %v910_v62, %v814_v1  ;;  %v821_v12 = vor.u32 %v913_v3, %v820_v2  ;;  %v796_v14 = vld [vmem:[#allocation6 + $0x180] sm:$0xf] }
  0x29   :  { %v833_v55 = vor.u32 %v914_v46, %v830_v47  ;;  %v908_v15 = vld [vmem:[#allocation6 + $0x18c] sm:$0xf0]  ;;  %v907_v20 = vld [vmem:[#allocation6 + $0x18c] sm:$0xf]  ;;  %v806_v21 = vld [vmem:[#allocation6 + $0x198] sm:$0xf0] }
  0x2a   :  { %v797_v22 = vor.u32 %v908_v15, %v796_v14  ;;  %v809_v25 = vor.u32 %v907_v20, %v806_v21  ;;  %v780_v26 = vld [vmem:[#allocation6 + $0x160] sm:$0xf]  ;;  %v904_v27 = vld [vmem:[#allocation6 + $0x16c] sm:$0xf0]  ;;  %v902_v28 = vld [vmem:[#allocation6 + $0x164] sm:$0xf] }
  0x2b   :  { %v782_v29 = vld [vmem:[#allocation6 + $0x170] sm:$0xf0]  ;;  %v788_v30 = vld [vmem:[#allocation6 + $0x168] sm:$0xf]  ;;  %v903_v32 = vld [vmem:[#allocation6 + $0x16c] sm:$0xf]  ;;  %v781_v34 = vor.u32 %v904_v27, %v780_v26 }
  0x2c   :  { %v790_v33 = vld [vmem:[#allocation6 + $0x178] sm:$0xf0]  ;;  %v764_v38 = vld [vmem:[#allocation6 + $0x140] sm:$0xf]  ;;  %v899_v44 = vld [vmem:[#allocation6 + $0x14c] sm:$0xf] }
  0x2d   :  { %v793_v37 = vor.u32 %v903_v32, %v790_v33  ;;  %v774_v45 = vld [vmem:[#allocation6 + $0x158] sm:$0xf0]  ;;  %v892_v1 = vld [vmem:[#allocation6 + $0x10c] sm:$0xf0]  ;;  %v890_v2 = vld [vmem:[#allocation6 + $0x104] sm:$0xf] }
  0x2e   :  { %469 = vmatpush.bf16.xpose.msra.mxu0 %v653_v56  ;;  %v837_v56 = vor.u32 %v917_v49, %v836_v48  ;;  %v777_v49 = vor.u32 %v899_v44, %v774_v45  ;;  %v734_v3 = vld [vmem:[#allocation6 + $0x110] sm:$0xf0]  ;;  %v580_v33 = vld [vmem:[%s1049_s3] sm:$0x3]  ;;  %v592_v45 = vstv %s1050_s4 }
  0x2f   :  { %482 = vmatpush.bf16.xpose.msra.mxu1 %v657_v57  ;;  %v1018_v57 = vpack.c.b16 %v135_v53, %v135_v53  ;;  %v750_v53 = vld [vmem:[#allocation6 + $0x130] sm:$0xf0] }
  0x30   :  { %495 = vmatpush.bf16.xpose.msra.mxu2 %v661_v58  ;;  %508 = vmatpush.bf16.xpose.msra.mxu3 %v665_v59  ;;  %v841_v58 = vor.u32 %v915_v51, %v838_v52  ;;  %v136_v59 = vunpack.c.h.b16 %v66_v50  ;;  %v748_v50 = vld [vmem:[#allocation6 + $0x120] sm:$0xf]  ;;  %v896_v51 = vld [vmem:[#allocation6 + $0x12c] sm:$0xf0]  ;;  %v894_v52 = vld [vmem:[#allocation6 + $0x124] sm:$0xf] }
  0x31   :  { %v753_v60 = vor.u32 %v894_v52, %v750_v53 }
  0x32   :  { %v1021_v63 = vpack.c.b16 %v136_v59, %v136_v59  ;;  %v749_v59 = vor.u32 %v896_v51, %v748_v50 }
  0x36   :  { %470 = vmatpush.bf16.xpose.msra.mxu0 %v637_v4  ;;  %v133_v4 = vunpack.c.l.b16 %v65_v0 }
  0x37   :  { %483 = vmatpush.bf16.xpose.msra.mxu1 %v641_v5  ;;  %v134_v5 = vunpack.c.h.b16 %v65_v0  ;;  %v732_v0 = vld [vmem:[#allocation6 + $0x100] sm:$0xf] }
  0x38   :  { %496 = vmatpush.bf16.xpose.msra.mxu2 %v645_v6  ;;  %509 = vmatpush.bf16.xpose.msra.mxu3 %v649_v7  ;;  %v911_v6 = vld [vmem:[#allocation6 + $0x1ac] sm:$0xf]  ;;  %v822_v7 = vld [vmem:[#allocation6 + $0x1b8] sm:$0xf0]  ;;  %v1024_v9 = vpack.c.b16 %v133_v4, %v133_v4  ;;  %v740_v4 = vld [vmem:[#allocation6 + $0x108] sm:$0xf] }
  0x39   :  { %v1026_v10 = vpack.c.b16 %v134_v5, %v134_v5  ;;  %v825_v13 = vor.u32 %v911_v6, %v822_v7  ;;  %v893_v5 = vld [vmem:[#allocation6 + $0x114] sm:$0xf0]  ;;  %v891_v6 = vld [vmem:[#allocation6 + $0x10c] sm:$0xf]  ;;  %v742_v7 = vld [vmem:[#allocation6 + $0x118] sm:$0xf0] }
  0x3e   :  { %471 = vmatpush.bf16.xpose.msra.mxu0 %v621_v16  ;;  %v906_v16 = vld [vmem:[#allocation6 + $0x184] sm:$0xf] }
  0x3f   :  { %484 = vmatpush.bf16.xpose.msra.mxu1 %v625_v17  ;;  %v798_v17 = vld [vmem:[#allocation6 + $0x190] sm:$0xf0] }
  0x40   :  { %497 = vmatpush.bf16.xpose.msra.mxu2 %v629_v18  ;;  %510 = vmatpush.bf16.xpose.msra.mxu3 %v633_v19  ;;  %v804_v18 = vld [vmem:[#allocation6 + $0x188] sm:$0xf]  ;;  %v909_v19 = vld [vmem:[#allocation6 + $0x194] sm:$0xf0]  ;;  %v801_v23 = vor.u32 %v906_v16, %v798_v17 }
  0x41   :  { %v805_v24 = vor.u32 %v909_v19, %v804_v18 }
  0x46   :  { %472 = vmatpush.bf16.xpose.msra.mxu0 %v605_v31  ;;  %v905_v31 = vld [vmem:[#allocation6 + $0x174] sm:$0xf0] }
  0x47   :  { %485 = vmatpush.bf16.xpose.msra.mxu1 %v609_v35  ;;  %v785_v35 = vor.u32 %v902_v28, %v782_v29 }
  0x48   :  { %498 = vmatpush.bf16.xpose.msra.mxu2 %v613_v36  ;;  %511 = vmatpush.bf16.xpose.msra.mxu3 %v617_v39  ;;  %v789_v36 = vor.u32 %v905_v31, %v788_v30  ;;  %v900_v39 = vld [vmem:[#allocation6 + $0x14c] sm:$0xf0] }
  0x49   :  { %v765_v46 = vor.u32 %v900_v39, %v764_v38  ;;  %v583_v38 = vperm.slane %v580_v33, 1 }
  0x4d   :  { %473 = vmatmul.bf16.vlgmr.msra.gmra.mxu0 %v1024_v9 }
  0x4e   :  { %517 = vmatpush.bf16.xpose.msrb.mxu0 %v845_v40  ;;  %486 = vmatmul.bf16.vlgmr.msra.gmra.mxu1 %v1026_v10  ;;  %v898_v40 = vld [vmem:[#allocation6 + $0x144] sm:$0xf] }
  0x4f   :  { %530 = vmatpush.bf16.xpose.msrb.mxu1 %v849_v41  ;;  %499 = vmatmul.bf16.vlgmr.msra.gmra.mxu2 %v1018_v57  ;;  %v766_v41 = vld [vmem:[#allocation6 + $0x150] sm:$0xf0] }
  0x50   :  { %543 = vmatpush.bf16.xpose.msrb.mxu2 %v853_v42  ;;  %556 = vmatpush.bf16.xpose.msrb.mxu3 %v857_v43  ;;  %v772_v42 = vld [vmem:[#allocation6 + $0x148] sm:$0xf]  ;;  %v901_v43 = vld [vmem:[#allocation6 + $0x154] sm:$0xf0]  ;;  %v769_v47 = vor.u32 %v898_v40, %v766_v41 }
  0x51   :  { %512 = vmatmul.bf16.vlgmr.msra.gmra.mxu3 %v1021_v63  ;;  %v773_v48 = vor.u32 %v901_v43, %v772_v42 }
  0x56   :  { %518 = vmatpush.bf16.xpose.msrb.mxu0 %v829_v54  ;;  %v756_v54 = vld [vmem:[#allocation6 + $0x128] sm:$0xf] }
  0x57   :  { %531 = vmatpush.bf16.xpose.msrb.mxu1 %v833_v55  ;;  %v897_v55 = vld [vmem:[#allocation6 + $0x134] sm:$0xf0] }
  0x58   :  { %544 = vmatpush.bf16.xpose.msrb.mxu2 %v837_v56  ;;  %557 = vmatpush.bf16.xpose.msrb.mxu3 %v841_v58  ;;  %v895_v56 = vld [vmem:[#allocation6 + $0x12c] sm:$0xf]  ;;  %v758_v58 = vld [vmem:[#allocation6 + $0x138] sm:$0xf0]  ;;  %v757_v61 = vor.u32 %v897_v55, %v756_v54 }
  0x59   :  { %v761_v62 = vor.u32 %v895_v56, %v758_v58 }
  0x5e   :  { %519 = vmatpush.bf16.xpose.msrb.mxu0 %v813_v8  ;;  %v733_v8 = vor.u32 %v892_v1, %v732_v0 }
  0x5f   :  { %532 = vmatpush.bf16.xpose.msrb.mxu1 %v817_v11  ;;  %v737_v11 = vor.u32 %v890_v2, %v734_v3 }
  0x60   :  { %545 = vmatpush.bf16.xpose.msrb.mxu2 %v821_v12  ;;  %558 = vmatpush.bf16.xpose.msrb.mxu3 %v825_v13  ;;  %v741_v12 = vor.u32 %v893_v5, %v740_v4  ;;  %v745_v13 = vor.u32 %v891_v6, %v742_v7 }
  0x66   :  { %520 = vmatpush.bf16.xpose.msrb.mxu0 %v797_v22 }
  0x67   :  { %533 = vmatpush.bf16.xpose.msrb.mxu1 %v801_v23 }
  0x68   :  { %546 = vmatpush.bf16.xpose.msrb.mxu2 %v805_v24  ;;  %559 = vmatpush.bf16.xpose.msrb.mxu3 %v809_v25 }
  0x6e   :  { %521 = vmatpush.bf16.xpose.msrb.mxu0 %v781_v34 }
  0x6f   :  { %534 = vmatpush.bf16.xpose.msrb.mxu1 %v785_v35 }
  0x70   :  { %547 = vmatpush.bf16.xpose.msrb.mxu2 %v789_v36  ;;  %560 = vmatpush.bf16.xpose.msrb.mxu3 %v793_v37  ;;  %v582_v37 = vperm.slane %v580_v33, 0 }
  0x76   :  { %522 = vmatpush.bf16.xpose.msrb.mxu0 %v765_v46 }
  0x77   :  { %535 = vmatpush.bf16.xpose.msrb.mxu1 %v769_v47 }
  0x78   :  { %548 = vmatpush.bf16.xpose.msrb.mxu2 %v773_v48  ;;  %561 = vmatpush.bf16.xpose.msrb.mxu3 %v777_v49 }
  0x7e   :  { %523 = vmatpush.bf16.xpose.msrb.mxu0 %v749_v59 }
  0x7f   :  { %536 = vmatpush.bf16.xpose.msrb.mxu1 %v753_v60 }
  0x80   :  { %549 = vmatpush.bf16.xpose.msrb.mxu2 %v757_v61  ;;  %562 = vmatpush.bf16.xpose.msrb.mxu3 %v761_v62 }
  0x86   :  { %524 = vmatpush.bf16.xpose.msrb.mxu0 %v733_v8 }
  0x87   :  { %537 = vmatpush.bf16.xpose.msrb.mxu1 %v737_v11 }
  0x88   :  { %550 = vmatpush.bf16.xpose.msrb.mxu2 %v741_v12  ;;  %563 = vmatpush.bf16.xpose.msrb.mxu3 %v745_v13 }
  0x8d   :  { %525 = vmatmul.bf16.vlgmr.msrb.gmra.mxu0 %v1024_v9  ;;  %v55_v9 = vld [vmem:[%s1048_s2] sm:$0x3] }
  0x8e   :  { %538 = vmatmul.bf16.vlgmr.msrb.gmra.mxu1 %v1026_v10  ;;  %v57_v25 = vperm.slane %v55_v9, 0  ;;  %v58_v29 = vperm.slane %v55_v9, 1 }
  0x8f   :  { %551 = vmatmul.bf16.vlgmr.msrb.gmra.mxu2 %v1018_v57  ;;  %564 = vmatmul.bf16.vlgmr.msrb.gmra.mxu3 %v1021_v63 }
  0xca   :  { %v474_v15 = vpop.f32.mrf.mxu0 }
  0xcb   :  { %v487_v16 = vpop.f32.mrf.mxu1 }
  0xcc   :  { %v488_v22 = vadd.f32 %v487_v16, %v474_v15 }
  0xd2   :  { %v500_v14 = vpop.f32.mrf.mxu2  ;;  %v476_v19 = vpop.f32.mrf.mxu0 }
  0xd3   :  { %v489_v20 = vpop.f32.mrf.mxu1  ;;  %v501_v23 = vadd.f32 %v500_v14, %v488_v22 }
  0xd4   :  { %v513_v17 = vpop.f32.mrf.mxu3 }
  0xd5   :  { %v514_v57 = vadd.f32 %v513_v17, %v501_v23 }
  0xd7   :  { %v569_v27 = vadd.f32 %v514_v57, %v57_v25 }
  0xd9   :  { %v578_v35 = vmax.f32 %v569_v27, 0.0 }
  0xda   :  { %v502_v18 = vpop.f32.mrf.mxu2 }
  0xdb   :  { %v586_v42 = vmul.f32 %v582_v37, %v578_v35 }
  0xdc   :  { %v515_v21 = vpop.f32.mrf.mxu3 }
 0x10a   :  { %v526_v24 = vpop.f32.mrf.mxu0 }
 0x10b   :  { %v539_v10 = vpop.f32.mrf.mxu1 }
 0x10c   :  { %v540_v26 = vadd.f32 %v539_v10, %v526_v24 }
 0x112   :  { %v552_v63 = vpop.f32.mrf.mxu2  ;;  %v565_v30 = vpop.f32.mrf.mxu3 }
 0x113   :  { %v553_v28 = vadd.f32 %v552_v63, %v540_v26  ;;  %v528_v31 = vpop.f32.mrf.mxu0  ;;  %v541_v32 = vpop.f32.mrf.mxu1 }
 0x115   :  { %v566_v34 = vadd.f32 %v565_v30, %v553_v28 }
 0x117   :  { %v570_v36 = vadd.f32 %v566_v34, %v58_v29 }
 0x119   :  { %v579_v39 = vmax.f32 %v570_v36, 0.0 }
 0x11a   :  { %v554_v40 = vpop.f32.mrf.mxu2  ;;  %v567_v41 = vpop.f32.mrf.mxu3 }
 0x11b   :  { %v587_v43 = vmul.f32 %v583_v38, %v579_v39 }
 0x11d   :  { %v588_v44 = vadd.f32 %v587_v43, %v586_v42 }
 0x11f   :  { %589 = vadd.xlane.f32.xlu0 %v588_v44 }
 0x192   :  { %v590_v46 = vpop.xlane.xlu0 %589 }
 0x193   :  { %v593_v47 = vadd.f32 %v592_v45, %v590_v46 }
 0x195   :  { %595 = vst.msk [vmem:[%s1051_s5] sm:$0xff] %vm594_vm0, %v593_v47 }
 0x196   :  { %600 = vsyncpa [#allocation5], 1 }
 0x197   :  { %601 = vsyncpa [#allocation7], 1 }

</bundles_post_ra>
